<compile_context>
chip_gen: v5e
topology: v5e:2x2
jax: 0.10.0
libtpu: 0.0.40
codegen_flags: <defaults>
</compile_context>

<pallas_src>
import jax
import jax.numpy as jnp
from jax import lax
from jax.experimental import pallas as pl
from jax.experimental.pallas import tpu as pltpu

_EPS = 1e-8             # torch.nn.CosineSimilarity default eps
_LANE = 128             # TPU lane width
_MAX_ONEHOT_ROWS = 256  # fused (one-hot MXU gather) path gate: Nc + Nv <= this


def _round_up(x, m):
    return ((x + m - 1) // m) * m


def _vmem_budget_bytes():
    """One VMEM budget used both for tile sizing and vmem_limit_bytes."""
    phys = 64 * 1024 * 1024                      # conservative default (v7x per-TC)
    try:
        info = pltpu.get_tpu_info()
        phys = int(getattr(info, "vmem_capacity_bytes", phys)) or phys
    except Exception:
        pass
    # ~half of physical, capped at 48 MiB (v5e/v6e: 48 MiB of 128; v7x: 32 of 64).
    return min(phys // 2, 48 * 1024 * 1024)


def _cosine_from_transposed(a, b, o_ref):
    """a, b: (D, TE) f32 (edges on lanes). Writes (2, TE) [cos, 1-cos]."""
    dot = jnp.sum(a * b, axis=0, keepdims=True)      # (1, TE)
    na2 = jnp.sum(a * a, axis=0, keepdims=True)
    nb2 = jnp.sum(b * b, axis=0, keepdims=True)
    # PyTorch clamps ||a||^2 * ||b||^2 at eps^2 before the rsqrt.
    cos = dot * lax.rsqrt(jnp.maximum(na2 * nb2, _EPS * _EPS))
    o_ref[0:1, :] = cos.astype(o_ref.dtype)
    o_ref[1:2, :] = (1.0 - cos).astype(o_ref.dtype)


def _cosine_fused_kernel(idx_ref, custT_ref, varT_ref, o_ref):
    # idx_ref:   (2, TE) int32 -- row ids / col ids, edges on lanes.
    # custT_ref: (D, Nc), varT_ref: (D, Nv) -- full tables, VMEM-resident
    #            across the whole grid (constant index_map).
    # o_ref:     (2, TE) -- row 0 = cos, row 1 = 1 - cos.
    rows = idx_ref[0:1, :]                                   # (1, TE) int32
    cols = idx_ref[1:2, :]
    custT = custT_ref[...].astype(jnp.float32)               # (D, Nc)
    varT = varT_ref[...].astype(jnp.float32)                 # (D, Nv)
    nc = custT.shape[1]
    nv = varT.shape[1]
    te = rows.shape[1]

    # In-kernel gather as a one-hot matmul on the (idle) MXU; result lands
    # directly in the (D, TE) edges-on-lanes layout, so no in-kernel transpose.
    oh_r = (lax.broadcasted_iota(jnp.int32, (nc, te), 0) == rows).astype(jnp.float32)
    oh_c = (lax.broadcasted_iota(jnp.int32, (nv, te), 0) == cols).astype(jnp.float32)
    a = jnp.dot(custT, oh_r, preferred_element_type=jnp.float32)   # (D, TE)
    b = jnp.dot(varT, oh_c, preferred_element_type=jnp.float32)    # (D, TE)

    _cosine_from_transposed(a, b, o_ref)


def _cosine_pregathered_kernel(a_ref, b_ref, o_ref):
    # Fallback: inputs already gathered by XLA, presented as (D, TE) tiles.
    a = a_ref[...].astype(jnp.float32)
    b = b_ref[...].astype(jnp.float32)
    _cosine_from_transposed(a, b, o_ref)


def _pick_edge_tile(E, per_edge_bytes, static_bytes, tile_budget, max_edge_tile):
    if E < _LANE:
        return E                       # single block == full edge extent (legal)
    te_mem = max(_LANE, (tile_budget - static_bytes) // max(per_edge_bytes, 1))
    te = max(_LANE, min(max_edge_tile, te_mem))
    te = (te // _LANE) * _LANE
    # Keep >= 2 tiles when E is large so the "parallel" axis spans both of
    # v7x's TensorCores (harmless on 1-TC v5e/v6e).
    if E > 2 * _LANE:
        te = min(te, max(_LANE, _round_up(pl.cdiv(E, 2), _LANE)))
    return te


def cosine_prediction(x_dict, edge_label_index, *, max_edge_tile=16384,
                      input_dtype=None, force_unfused=False):
    """Pallas implementation of CosinePrediction.forward.

    x_dict: {'customer': (Nc, D), 'variant': (Nv, D)} float arrays (f32 or bf16)
    edge_label_index: int array (2, E)
    input_dtype: optionally cast embeddings at the pallas_call boundary
        (e.g. jnp.bfloat16 to halve input HBM traffic; kernel accumulates f32).
    returns: (E, 2) array [cos, 1 - cos]
    """
    cust = x_dict["customer"]
    var = x_dict["variant"]
    out_dtype = jnp.result_type(cust.dtype, var.dtype)
    if input_dtype is not None:
        cust = cust.astype(input_dtype)
        var = var.astype(input_dtype)

    idx = jnp.asarray(edge_label_index, jnp.int32)        # (2, E)
    E = idx.shape[1]
    Nc, D = cust.shape
    Nv, _ = var.shape

    budget = _vmem_budget_bytes()
    tile_budget = int(budget * 0.7)                        # headroom for scratch
    out_bytes = jnp.dtype(out_dtype).itemsize
    in_bytes = max(jnp.dtype(cust.dtype).itemsize, jnp.dtype(var.dtype).itemsize)

    table_bytes = 2 * (Nc + Nv) * D * in_bytes             # x2: pipeline buffers
    use_fused = (not force_unfused
                 and (Nc + Nv) <= _MAX_ONEHOT_ROWS
                 and table_bytes <= tile_budget // 4)

    compiler_params = pltpu.CompilerParams(
        dimension_semantics=("parallel",),
        vmem_limit_bytes=budget,
    )

    if use_fused:
        # Tables are tiny here; transpose them once in XLA so the in-kernel
        # matmul lands directly in (D, TE) without any in-kernel transpose.
        custT = cust.T                                      # (D, Nc)
        varT = var.T                                        # (D, Nv)
        per_edge = (2 * 4 * 2            # (2,TE) int32 indices, double-buffered
                    + 2 * out_bytes * 2  # (2,TE) output, double-buffered
                    + (Nc + Nv) * 4      # one-hot matrices (f32)
                    + 2 * D * 4          # gathered a, b (f32)
                    + 32)                # reduction rows / slack
        te = _pick_edge_tile(E, per_edge, table_bytes, tile_budget, max_edge_tile)
        grid = (pl.cdiv(E, te),)

        out = pl.pallas_call(
            _cosine_fused_kernel,
            out_shape=jax.ShapeDtypeStruct((2, E), out_dtype),
            grid_spec=pltpu.PrefetchScalarGridSpec(
                num_scalar_prefetch=0,
                grid=grid,
                in_specs=[
                    pl.BlockSpec((2, te), lambda i: (0, i)),     # edge indices
                    pl.BlockSpec((D, Nc), lambda i: (0, 0)),     # resident table
                    pl.BlockSpec((D, Nv), lambda i: (0, 0)),     # resident table
                ],
                out_specs=pl.BlockSpec((2, te), lambda i: (0, i)),
            ),
            compiler_params=compiler_params,
        )(idx, custT, varT)
    else:
        # TODO(synk): for large tables, an in-kernel per-row DMA gather from
        # memory_space=pl.ANY tables would avoid materializing the gathered
        # (D, E) arrays; it only pays off when D * itemsize >= ~512 B.
        a = cust[idx[0]].T                                   # (D, E)
        b = var[idx[1]].T                                    # (D, E)
        per_edge = (2 * D * in_bytes * 2  # a, b tiles, double-buffered
                    + 2 * out_bytes * 2   # output, double-buffered
                    + 2 * D * 4           # f32 upcast copies
                    + 32)
        te = _pick_edge_tile(E, per_edge, 0, tile_budget, max_edge_tile)
        grid = (pl.cdiv(E, te),)

        out = pl.pallas_call(
            _cosine_pregathered_kernel,
            out_shape=jax.ShapeDtypeStruct((2, E), out_dtype),
            grid_spec=pltpu.PrefetchScalarGridSpec(
                num_scalar_prefetch=0,
                grid=grid,
                in_specs=[
                    pl.BlockSpec((D, te), lambda i: (0, i)),
                    pl.BlockSpec((D, te), lambda i: (0, i)),
                ],
                out_specs=pl.BlockSpec((2, te), lambda i: (0, i)),
            ),
            compiler_params=compiler_params,
        )(a, b)

    # Module interface is (E, 2) = [cos, 1 - cos]; callers that can consume
    # (2, E) directly should take `out` before this transpose.
    return out.T


if __name__ == "__main__":
    key = jax.random.PRNGKey(0)
    k1, k2, k3, k4 = jax.random.split(key, 4)

    num_customers = 16
    num_variants = 16
    hidden = 32          # embedding dim D
    num_edges = 8

    x_dict = {
        "customer": jax.random.normal(k1, (num_customers, hidden), dtype=jnp.float32),
        "variant": jax.random.normal(k2, (num_variants, hidden), dtype=jnp.float32),
    }
    edge_label_index = jnp.stack(
        [
            jax.random.randint(k3, (num_edges,), 0, num_customers),
            jax.random.randint(k4, (num_edges,), 0, num_variants),
        ],
        axis=0,
    )

    # Primary (fused in-kernel gather) path and the large-table fallback path.
    out_fused = jax.block_until_ready(cosine_prediction(x_dict, edge_label_index))
    out_unfused = jax.block_until_ready(
        cosine_prediction(x_dict, edge_label_index, force_unfused=True)
    )

    # Reference in plain JAX (PyTorch eps semantics: clamp product of squared
    # norms at eps^2).
    a = x_dict["customer"][edge_label_index[0]]
    b = x_dict["variant"][edge_label_index[1]]
    dot = jnp.sum(a * b, axis=1)
    denom = jnp.sqrt(
        jnp.maximum(jnp.sum(a * a, axis=1) * jnp.sum(b * b, axis=1), _EPS * _EPS)
    )
    cos_ref = dot / denom
    ref = jnp.stack([cos_ref, 1.0 - cos_ref], axis=1)

    assert out_fused.shape == (num_edges, 2)
    assert out_unfused.shape == (num_edges, 2)
    assert jnp.allclose(out_fused, ref, atol=1e-5, rtol=1e-5)
    assert jnp.allclose(out_unfused, ref, atol=1e-5, rtol=1e-5)

    print("KERNEL_OK")
</pallas_src>

<mosaic_0001>
module attributes {stable_mosaic.version = 11 : i64} {
  func.func @_cosine_fused_kernel(%arg0: i32, %arg1: memref<2x8xi32, #tpu.memory_space<vmem>>, %arg2: memref<32x16xf32, #tpu.memory_space<vmem>>, %arg3: memref<32x16xf32, #tpu.memory_space<vmem>>, %arg4: memref<2x8xf32, #tpu.memory_space<vmem>>) attributes {dimension_semantics = [#tpu.dimension_semantics<parallel>], iteration_bounds = array<i64: 1>, scalar_prefetch = 0 : i64, scratch_operands = 0 : i64, tpu.core_type = #tpu.core_type<tc>, window_params = [{transform_indices = @transform_0, window_bounds = array<i64: 2, 8>}, {pipeline_mode = #tpu.pipeline_mode<synchronous>, transform_indices = @transform_1, window_bounds = array<i64: 32, 16>}, {pipeline_mode = #tpu.pipeline_mode<synchronous>, transform_indices = @transform_2, window_bounds = array<i64: 32, 16>}, {transform_indices = @transform_3, window_bounds = array<i64: 2, 8>}]} {
    %c0 = arith.constant 0 : index
    %c0_0 = arith.constant 0 : index
    %0 = vector.load %arg1[%c0, %c0_0] : memref<2x8xi32, #tpu.memory_space<vmem>>, vector<1x8xi32>
    %c1 = arith.constant 1 : index
    %c0_1 = arith.constant 0 : index
    %1 = vector.load %arg1[%c1, %c0_1] : memref<2x8xi32, #tpu.memory_space<vmem>>, vector<1x8xi32>
    %c0_2 = arith.constant 0 : index
    %c0_3 = arith.constant 0 : index
    %2 = vector.load %arg2[%c0_2, %c0_3] : memref<32x16xf32, #tpu.memory_space<vmem>>, vector<32x16xf32>
    %c0_4 = arith.constant 0 : index
    %c0_5 = arith.constant 0 : index
    %3 = vector.load %arg3[%c0_4, %c0_5] : memref<32x16xf32, #tpu.memory_space<vmem>>, vector<32x16xf32>
    %4 = tpu.iota {dimensions = array<i32: 0>} : vector<16x8xi32>
    %5 = vector.broadcast %0 : vector<1x8xi32> to vector<16x8xi32>
    %6 = arith.cmpi eq, %4, %5 : vector<16x8xi32>
    %7 = arith.extui %6 : vector<16x8xi1> to vector<16x8xi32>
    %8 = arith.sitofp %7 : vector<16x8xi32> to vector<16x8xf32>
    %9 = tpu.iota {dimensions = array<i32: 0>} : vector<16x8xi32>
    %10 = vector.broadcast %1 : vector<1x8xi32> to vector<16x8xi32>
    %11 = arith.cmpi eq, %9, %10 : vector<16x8xi32>
    %12 = arith.extui %11 : vector<16x8xi1> to vector<16x8xi32>
    %13 = arith.sitofp %12 : vector<16x8xi32> to vector<16x8xf32>
    %cst = arith.constant dense<0.000000e+00> : vector<32x8xf32>
    %14 = tpu.matmul %2, %8, %cst {dimension_numbers = #tpu.dot_dimension_numbers<[1], [0], [0], [1], [0, 0, 1, 1], [], []>} : vector<32x16xf32>, vector<16x8xf32>, vector<32x8xf32> -> vector<32x8xf32>
    %cst_6 = arith.constant dense<0.000000e+00> : vector<32x8xf32>
    %15 = tpu.matmul %3, %13, %cst_6 {dimension_numbers = #tpu.dot_dimension_numbers<[1], [0], [0], [1], [0, 0, 1, 1], [], []>} : vector<32x16xf32>, vector<16x8xf32>, vector<32x8xf32> -> vector<32x8xf32>
    %16 = arith.mulf %14, %15 : vector<32x8xf32>
    %cst_7 = arith.constant dense<0.000000e+00> : vector<8xf32>
    %17 = vector.multi_reduction <add>, %16, %cst_7 [0] : vector<32x8xf32> to vector<8xf32>
    %18 = vector.shape_cast %17 : vector<8xf32> to vector<1x8xf32>
    %19 = arith.mulf %14, %14 : vector<32x8xf32>
    %cst_8 = arith.constant dense<0.000000e+00> : vector<8xf32>
    %20 = vector.multi_reduction <add>, %19, %cst_8 [0] : vector<32x8xf32> to vector<8xf32>
    %21 = vector.shape_cast %20 : vector<8xf32> to vector<1x8xf32>
    %22 = arith.mulf %15, %15 : vector<32x8xf32>
    %cst_9 = arith.constant dense<0.000000e+00> : vector<8xf32>
    %23 = vector.multi_reduction <add>, %22, %cst_9 [0] : vector<32x8xf32> to vector<8xf32>
    %24 = vector.shape_cast %23 : vector<8xf32> to vector<1x8xf32>
    %25 = arith.mulf %21, %24 : vector<1x8xf32>
    %cst_10 = arith.constant 1.000000e-16 : f32
    %26 = vector.broadcast %cst_10 : f32 to vector<1x8xf32>
    %27 = arith.maximumf %25, %26 : vector<1x8xf32>
    %28 = math.rsqrt %27 : vector<1x8xf32>
    %29 = arith.mulf %18, %28 : vector<1x8xf32>
    %c0_11 = arith.constant 0 : index
    %c0_12 = arith.constant 0 : index
    %30 = vector.load %arg4[%c0_11, %c0_12] : memref<2x8xf32, #tpu.memory_space<vmem>>, vector<1x8xf32>
    tpu.vector_store %arg4[%c0_11, %c0_12], %29 {strides = array<i32>} : memref<2x8xf32, #tpu.memory_space<vmem>>, vector<1x8xf32>,
    %cst_13 = arith.constant 1.000000e+00 : f32
    %31 = vector.broadcast %cst_13 : f32 to vector<1x8xf32>
    %32 = arith.subf %31, %29 : vector<1x8xf32>
    %c1_14 = arith.constant 1 : index
    %c0_15 = arith.constant 0 : index
    %33 = vector.load %arg4[%c1_14, %c0_15] : memref<2x8xf32, #tpu.memory_space<vmem>>, vector<1x8xf32>
    tpu.vector_store %arg4[%c1_14, %c0_15], %32 {strides = array<i32>} : memref<2x8xf32, #tpu.memory_space<vmem>>, vector<1x8xf32>,
    return
  }
  func.func @transform_0(%arg0: i32) -> (i32, i32) {
    %c0_i32 = arith.constant 0 : i32
    %c0_i32_0 = arith.constant 0 : i32
    return %c0_i32, %arg0 : i32, i32
  }
  func.func @transform_1(%arg0: i32) -> (i32, i32) {
    %c0_i32 = arith.constant 0 : i32
    %c0_i32_0 = arith.constant 0 : i32
    %c0_i32_1 = arith.constant 0 : i32
    return %c0_i32, %c0_i32_0 : i32, i32
  }
  func.func @transform_2(%arg0: i32) -> (i32, i32) {
    %c0_i32 = arith.constant 0 : i32
    %c0_i32_0 = arith.constant 0 : i32
    %c0_i32_1 = arith.constant 0 : i32
    return %c0_i32, %c0_i32_0 : i32, i32
  }
  func.func @transform_3(%arg0: i32) -> (i32, i32) {
    %c0_i32 = arith.constant 0 : i32
    %c0_i32_0 = arith.constant 0 : i32
    return %c0_i32, %arg0 : i32, i32
  }
}

</mosaic_0001>

<bundles_post_ra>
// kernel: tpu_custom_call.1
= control target key start
LH: loop header
LB: loop body
LE: loop exit
PB: predicated region body
PF: predicated region fallthrough
CT: control target
= control target key end

     0   :  { %v25_v0 = vlaneseq  ;;  %s337_s0 = inlined_call_operand.vmem [shape: s32[2,8], index: 0, kind: input, shape index: {}]   ;;  %s338_s1 = inlined_call_operand.vmem [shape: f32[32,16], index: 1, kind: input, shape index: {}]   ;;  %s339_s2 = inlined_call_operand.vmem [shape: f32[32,16], index: 2, kind: input, shape index: {}]   ;;  %s340_s3 = inlined_call_operand.hbm [shape: f32[2,8], index: 3, kind: output, shape index: {}]  }
   0x1   :  { %v232_v2 = vld [vmem:[%s337_s0] ss:$0 sm:$0xff]  ;;  %v233_v3 = vld [vmem:[%s337_s0 + $0x1] ss:$0 sm:$0xff] }
   0x2   :  { %v26_v1 = vshrl.u32 %v25_v0, 7 }
   0x4   :  { %v27_v4 = vadd.s32 8, %v26_v1 }
   0x5   :  { %8 = vsyncpa [#allocation3], 0  ;;  %vm29_vm2 = vcmp.eq.s32.totalorder %v26_v1, %v232_v2  ;;  %v262_v5 = vmov 1.0   ;;  %vm36_vm3 = vcmp.eq.s32.totalorder %v26_v1, %v233_v3  ;;  %v17_v6 = vld [vmem:[%s338_s1] sm:$0xff]  ;;  %vm42_vm4 = vcmask 130048   ;;  %v19_v7 = vld [vmem:[%s338_s1 + $0x10] sm:$0xff] }
   0x6   :  { %vm30_vm0 = vcmp.eq.s32.totalorder %v27_v4, %v232_v2  ;;  %vm37_vm1 = vcmp.eq.s32.totalorder %v27_v4, %v233_v3  ;;  %v21_v8 = vld [vmem:[%s339_s2] sm:$0xff]  ;;  %v23_v9 = vld [vmem:[%s339_s2 + $0x10] sm:$0xff]  ;;  %v18_v10 = vld [vmem:[%s338_s1 + $0x8] sm:$0xff]  ;;  %vm129_vm5 = vcmask 64512   ;;  %vm190_vm9 = vcmask 57344   ;;  %s201_s6 = sshll.u32 %s340_s3, 4  ;;  %s202_s6 = int_to_ptr.hbm [resolvable:$true] %s201_s6 }
   0x7   :  { %214 = vmatpush.msk.msra.mxu0 %vm30_vm0, %v262_v5  ;;  %226 = vmatpush.msk.msra.mxu2 %vm30_vm0, %v262_v5  ;;  %v20_v11 = vld [vmem:[%s338_s1 + $0x18] sm:$0xff]  ;;  %v22_v12 = vld [vmem:[%s339_s2 + $0x8] sm:$0xff]  ;;  %s263_s1 = smov [#allocation2]  }
   0x8   :  { %220 = vmatpush.msk.msra.mxu1 %vm37_vm1, %v262_v5  ;;  %228 = vmatpush.msk.msra.mxu3 %vm37_vm1, %v262_v5  ;;  %v24_v13 = vld [vmem:[%s339_s2 + $0x18] sm:$0xff]  ;;  %s199_s2 = sshll.u32 %s263_s1, 4  ;;  %s200_s2 = int_to_ptr.vmem [resolvable:$true] %s199_s2 }
   0x9   :  { %215 = vmatpush.msk.msra.mxu0 %vm29_vm2, %v262_v5  ;;  %227 = vmatpush.msk.msra.mxu2 %vm29_vm2, %v262_v5 }
   0xa   :  { %221 = vmatpush.msk.msra.mxu1 %vm36_vm3, %v262_v5  ;;  %229 = vmatpush.msk.msra.mxu3 %vm36_vm3, %v262_v5 }
   0xb   :  { %216 = vmatmul.msk.f32.vlgmr.msra.gmra.mxu0 %vm42_vm4, %v17_v6  ;;  %218 = vmatmul.msk.f32.vlgmr.msra.gmra.mxu2 %vm42_vm4, %v19_v7 }
   0xc   :  { %222 = vmatmul.msk.f32.vlgmr.msra.gmra.mxu1 %vm42_vm4, %v21_v8  ;;  %224 = vmatmul.msk.f32.vlgmr.msra.gmra.mxu3 %vm42_vm4, %v23_v9 }
  0x13   :  { %217 = vmatmul.msk.f32.gmra.mxu0 %vm42_vm4, %v18_v10  ;;  %219 = vmatmul.msk.f32.gmra.mxu2 %vm42_vm4, %v20_v11 }
  0x14   :  { %223 = vmatmul.msk.f32.gmra.mxu1 %vm42_vm4, %v22_v12  ;;  %225 = vmatmul.msk.f32.gmra.mxu3 %vm42_vm4, %v24_v13 }
  0x88   :  { %v72_v14 = vpop.f32.mrf.mxu0 }
  0x89   :  { %v113_v15 = vpop.f32.mrf.mxu1  ;;  %v143_v17 = vmul.f32 %v72_v14, %v72_v14 }
  0x8a   :  { %v160_v19 = vmul.f32 %v113_v15, %v113_v15  ;;  %v125_v42 = vmul.f32 %v113_v15, %v72_v14 }
  0x8b   :  { %v147_v24 = vsel %vm129_vm5, %v143_v17, 0.0 }
  0x8c   :  { %v164_v27 = vsel %vm129_vm5, %v160_v19, 0.0  ;;  %v130_v49 = vsel %vm129_vm5, %v125_v42, 0.0 }
  0x8e   :  { %v78_v16 = vpop.f32.mrf.mxu2 }
  0x8f   :  { %v119_v18 = vpop.f32.mrf.mxu3  ;;  %v145_v25 = vmul.f32 %v78_v16, %v78_v16 }
  0x90   :  { %v75_v20 = vpop.f32.mrf.mxu0  ;;  %v162_v28 = vmul.f32 %v119_v18, %v119_v18  ;;  %v127_v50 = vmul.f32 %v119_v18, %v78_v16 }
  0x91   :  { %v144_v21 = vmul.f32 %v75_v20, %v75_v20  ;;  %v116_v22 = vpop.f32.mrf.mxu1  ;;  %v150_v33 = vsel %vm129_vm5, %v145_v25, 0.0 }
  0x92   :  { %v161_v23 = vmul.f32 %v116_v22, %v116_v22  ;;  %v167_v36 = vsel %vm129_vm5, %v162_v28, 0.0  ;;  %v126_v37 = vmul.f32 %v116_v22, %v75_v20  ;;  %v133_v57 = vsel %vm129_vm5, %v127_v50, 0.0 }
  0x93   :  { %v148_v26 = vsel %vm129_vm5, %v144_v21, 0.0 }
  0x94   :  { %v149_v29 = vadd.f32 %v148_v26, %v147_v24  ;;  %v165_v30 = vsel %vm129_vm5, %v161_v23, 0.0  ;;  %v131_v46 = vsel %vm129_vm5, %v126_v37, 0.0 }
  0x95   :  { %v166_v31 = vadd.f32 %v165_v30, %v164_v27  ;;  %v132_v53 = vadd.f32 %v131_v46, %v130_v49 }
  0x96   :  { %v81_v32 = vpop.f32.mrf.mxu2  ;;  %v151_v38 = vadd.f32 %v150_v33, %v149_v29 }
  0x97   :  { %v146_v34 = vmul.f32 %v81_v32, %v81_v32  ;;  %v122_v35 = vpop.f32.mrf.mxu3  ;;  %v168_v41 = vadd.f32 %v167_v36, %v166_v31  ;;  %v134_v60 = vadd.f32 %v133_v57, %v132_v53 }
  0x98   :  { %v163_v39 = vmul.f32 %v122_v35, %v122_v35  ;;  %v128_v52 = vmul.f32 %v122_v35, %v81_v32 }
  0x99   :  { %v152_v40 = vsel %vm129_vm5, %v146_v34, 0.0 }
  0x9a   :  { %v153_v43 = vadd.f32 %v152_v40, %v151_v38  ;;  %v169_v44 = vsel %vm129_vm5, %v163_v39, 0.0  ;;  %v135_v59 = vsel %vm129_vm5, %v128_v52, 0.0 }
  0x9b   :  { %v170_v45 = vadd.f32 %v169_v44, %v168_v41  ;;  %v136_v63 = vadd.f32 %v135_v59, %v134_v60 }
  0x9c   :  { %v154_v47 = vrot.slane %v153_v43, 4 }
  0x9d   :  { %v171_v48 = vrot.slane %v170_v45, 4  ;;  %v137_v3 = vrot.slane %v136_v63, 4 }
  0x9e   :  { %v155_v51 = vadd.f32 %v154_v47, %v153_v43 }
  0x9f   :  { %v172_v54 = vadd.f32 %v171_v48, %v170_v45  ;;  %v138_v6 = vadd.f32 %v137_v3, %v136_v63 }
  0xa0   :  { %v156_v55 = vrot.slane %v155_v51, 2 }
  0xa1   :  { %v173_v56 = vrot.slane %v172_v54, 2  ;;  %v139_v7 = vrot.slane %v138_v6, 2 }
  0xa2   :  { %v157_v58 = vadd.f32 %v156_v55, %v155_v51 }
  0xa3   :  { %v174_v61 = vadd.f32 %v173_v56, %v172_v54  ;;  %v140_v10 = vadd.f32 %v139_v7, %v138_v6 }
  0xa4   :  { %v158_v62 = vrot.slane %v157_v58, 1 }
  0xa5   :  { %v175_v0 = vrot.slane %v174_v61, 1  ;;  %v141_v13 = vrot.slane %v140_v10, 1 }
  0xa6   :  { %v159_v1 = vadd.f32 %v158_v62, %v157_v58 }
  0xa7   :  { %v176_v2 = vadd.f32 %v175_v0, %v174_v61  ;;  %v142_v16 = vadd.f32 %v141_v13, %v140_v10 }
  0xa9   :  { %v177_v4 = vmul.f32 %v176_v2, %v159_v1 }
  0xab   :  { %v178_v5 = vmax.f32 %v177_v4, 1e-16 }
  0xad   :  { %234 = vrsqrt.f32 %v178_v5  ;;  %vm185_vm7 = vweird.f32 %v178_v5 }
  0xb3   :  { %v235_v8 = vpop.eup %234 }
  0xb4   :  { %v180_v9 = vmul.f32 %v235_v8, %v178_v5  ;;  %vm186_vm6 = vweird.f32 %v235_v8 }
  0xb5   :  { %vm187_vm8 = vmor %vm185_vm7, %vm186_vm6 }
  0xb6   :  { %v181_v11 = vmul.f32 %v235_v8, %v180_v9 }
  0xb8   :  { %v182_v12 = vmul.f32 0.5, %v181_v11 }
  0xba   :  { %v183_v14 = vsub.f32 1.5, %v182_v12 }
  0xbc   :  { %v184_v15 = vmul.f32 %v235_v8, %v183_v14 }
  0xbe   :  { %v188_v17 = vsel %vm187_vm8, %v235_v8, %v184_v15 }
  0xbf   :  { %v189_v18 = vmul.f32 %v188_v17, %v142_v16 }
  0xc1   :  { %191 = vst.msk [vmem:[#allocation2] sm:$0x1] %vm190_vm9, %v189_v18  ;;  %v192_v19 = vsub.f32 1.0, %v189_v18 }
  0xc3   :  { %193 = vst.msk [vmem:[#allocation2 + $0x1] sm:$0x1] %vm190_vm9, %v192_v19 }
  0xc4   :  { %204 = dma.vmem_to_hbm [thread:$0]  %s200_s2, 32, %s202_s6, [#allocation3]  }
  0xc5   :  { %260 = dma.done.wait [#allocation3], 32  }
  0xc6   :  { %261 = vsyncadd [#allocation3], 4294967264 }
  0xc7   :  { %209 = vsyncpa [#allocation3], 1 }

</bundles_post_ra>
